<compile_context>
chip_gen: v7x
topology: tpu7x:2x2x1
jax: 0.10.0
libtpu: 0.0.40
codegen_flags: <defaults>
</compile_context>

<pallas_src>
import functools

import jax
import jax.numpy as jnp
from jax.experimental import pallas as pl
from jax.experimental.pallas import tpu as pltpu

# Sentinel for padded entries of the pre-scaled inputs.  tanh(valid - SENTINEL)
# saturates to exactly +1.0 in both f32 and bf16 (finite, no inf/NaN).
_SENTINEL = -1.0e30


def _round_up(x, m):
    return ((x + m - 1) // m) * m


def _device_kind():
    try:
        return jax.devices()[0].device_kind.lower()
    except Exception:
        return ""


def _is_v7():
    kind = _device_kind()
    return ("v7" in kind) or ("7x" in kind)


def _default_compute_dtype():
    """bf16 pairwise tile on bf16-capable VPU/EUP chips (v6e/v7x), f32 otherwise."""
    kind = _device_kind()
    if ("v6" in kind) or ("v7" in kind) or ("7x" in kind):
        return jnp.bfloat16
    return jnp.float32  # v5e and older: no bf16 VPU/EUP path -> bf16 would regress


def _soft_rank_kernel(p_i_ref, t_i_ref, p_j_ref, t_j_ref,
                      pred_rank_ref, targ_rank_ref):
    """One (i, j) tile of the pairwise soft-rank sums.

    p_i_ref / t_i_ref : (1, ti)  pre-scaled values, rank index i on the LANE axis
    p_j_ref / t_j_ref : (tj, 1)  pre-scaled values, reduction index j on sublanes
    pred_rank_ref / targ_rank_ref : (1, ti) f32 lane-dense rank accumulators,
        resident across the j grid axis (same output block for every j).

    No padding mask: padded entries hold the -1e30 sentinel, so their tanh
    contribution to every valid lane is the constant +1.0, which cancels under
    the centered Pearson finalize (padded i lanes are masked there).
    """
    j = pl.program_id(1)

    @pl.when(j == 0)
    def _init():
        pred_rank_ref[...] = jnp.zeros_like(pred_rank_ref)
        targ_rank_ref[...] = jnp.zeros_like(targ_rank_ref)

    # (tj, ti) pairwise tile: tanh(scale * (x[i] - x[j])), scale folded into inputs.
    p_sign = jnp.tanh(p_i_ref[...] - p_j_ref[...])
    t_sign = jnp.tanh(t_i_ref[...] - t_j_ref[...])

    if p_sign.dtype == jnp.float32:
        # f32 path: exact sublane reduce (VALU/XLU have slack once the mask is
        # gone; an f32 MXU matmul would round operands through bf16 passes).
        p_part = jnp.sum(p_sign, axis=0, keepdims=True, dtype=jnp.float32)
        t_part = jnp.sum(t_sign, axis=0, keepdims=True, dtype=jnp.float32)
    else:
        # bf16 path: push the reduction onto the idle MXU; f32 accumulation of
        # bf16 operands against an exact ones matrix is exact.
        tj = p_sign.shape[0]
        ones = jnp.ones((8, tj), dtype=p_sign.dtype)
        p_part = jnp.dot(ones, p_sign, preferred_element_type=jnp.float32)[0:1, :]
        t_part = jnp.dot(ones, t_sign, preferred_element_type=jnp.float32)[0:1, :]

    pred_rank_ref[...] += p_part
    targ_rank_ref[...] += t_part


def _pearson_kernel(pr_ref, tr_ref, out_ref, *, n_valid, need_mask):
    """O(n) finalize: Pearson correlation of the two (1, n_pad) rank rows."""
    pr = pr_ref[...]
    tr = tr_ref[...]

    if need_mask:
        lane = jax.lax.broadcasted_iota(jnp.int32, pr.shape, 1)
        valid = lane < n_valid
        pr = jnp.where(valid, pr, 0.0)
        tr = jnp.where(valid, tr, 0.0)

    inv_n = jnp.float32(1.0 / n_valid)
    p_mean = jnp.sum(pr) * inv_n
    t_mean = jnp.sum(tr) * inv_n

    pc = pr - p_mean
    tc = tr - t_mean
    if need_mask:
        pc = jnp.where(valid, pc, 0.0)
        tc = jnp.where(valid, tc, 0.0)

    numerator = jnp.sum(pc * tc)
    denominator = jnp.sqrt(jnp.sum(pc * pc)) * jnp.sqrt(jnp.sum(tc * tc))
    # Same semantics as the PyTorch module (no epsilon guard on the denominator).
    out_ref[0] = -(numerator / denominator)


def spearman_loss(predictions, targets, temperature=0.01, compute_dtype=None):
    """Differentiable SpearmanLoss forward: returns -soft_spearman_corr (scalar).

    compute_dtype: dtype of the n^2 pairwise tanh tile.  None -> chip default
    (bf16 on v6e/v7x, f32 on v5e and older).  Rank accumulation and the Pearson
    finalize are always float32.
    """
    n = predictions.shape[0]
    if compute_dtype is None:
        compute_dtype = _default_compute_dtype()

    # tanh trick: sigmoid(d/T) = 0.5*tanh(d * 0.5/T) + 0.5; Pearson of the ranks
    # is invariant to that per-variable affine map.  Fold the scale in once (O(n)).
    scale = jnp.float32(0.5 / temperature)
    p = predictions.astype(jnp.float32) * scale
    t = targets.astype(jnp.float32) * scale

    is_v7 = _is_v7()

    # Tile sizes: lane tile ti up to 2048, sublane tile tj up to 512.  Live sign
    # temporaries <= ~8 MiB f32 / ~4 MiB bf16 -> fits all of v5e / v6e / v7x.
    ti = min(2048, max(128, pl.next_power_of_2(n)))
    if is_v7 and n >= 256:
        # Guarantee >= 2 i-blocks so the "parallel" i axis feeds both TensorCores.
        ti = max(128, min(ti, pl.next_power_of_2(n) // 2))
    tj = min(512, ti)
    n_pad = _round_up(n, ti)
    need_mask = n_pad != n

    if need_mask:
        # Sentinel padding (see _soft_rank_kernel docstring): no in-kernel mask.
        p = jnp.pad(p, (0, n_pad - n), constant_values=_SENTINEL)
        t = jnp.pad(t, (0, n_pad - n), constant_values=_SENTINEL)

    # Lane-dense row operands for the i axis; pre-transposed column operands for
    # the j axis (no full in-kernel transpose).
    p_row = p.reshape(1, n_pad).astype(compute_dtype)
    t_row = t.reshape(1, n_pad).astype(compute_dtype)
    p_col = p.reshape(n_pad, 1).astype(compute_dtype)
    t_col = t.reshape(n_pad, 1).astype(compute_dtype)

    grid_i = n_pad // ti
    grid_j = n_pad // tj
    itemsize = jnp.dtype(compute_dtype).itemsize

    pred_ranks, targ_ranks = pl.pallas_call(
        _soft_rank_kernel,
        out_shape=(
            jax.ShapeDtypeStruct((1, n_pad), jnp.float32),
            jax.ShapeDtypeStruct((1, n_pad), jnp.float32),
        ),
        grid_spec=pltpu.PrefetchScalarGridSpec(
            num_scalar_prefetch=0,
            grid=(grid_i, grid_j),
            in_specs=[
                pl.BlockSpec((1, ti), lambda i, j: (0, i)),
                pl.BlockSpec((1, ti), lambda i, j: (0, i)),
                pl.BlockSpec((tj, 1), lambda i, j: (j, 0)),
                pl.BlockSpec((tj, 1), lambda i, j: (j, 0)),
            ],
            out_specs=(
                pl.BlockSpec((1, ti), lambda i, j: (0, i)),
                pl.BlockSpec((1, ti), lambda i, j: (0, i)),
            ),
        ),
        compiler_params=pltpu.CompilerParams(
            # i axis independent (megacore split on v7x); j is the reduction axis.
            dimension_semantics=("parallel", "arbitrary"),
            # 128 MiB physical VMEM on v5e/v6e -> ~100 MiB scoped; v7x has only
            # 64 MiB physical, keep the budget under ~48 MiB there.
            vmem_limit_bytes=(48 << 20) if is_v7 else (100 << 20),
        ),
        cost_estimate=pl.CostEstimate(
            flops=int(8 * n_pad * n_pad),
            transcendentals=int(2 * n_pad * n_pad),
            bytes_accessed=int(2 * n_pad * (grid_i + grid_j + 1) * itemsize
                               + 2 * n_pad * 4 * (grid_j + 1)),
        ),
    )(p_row, t_row, p_col, t_col)

    # O(n) Pearson finalize.  Kept as a separate tiny kernel so the main grid's
    # i axis can be freely split across v7x's two TensorCores.
    loss = pl.pallas_call(
        functools.partial(_pearson_kernel, n_valid=n, need_mask=need_mask),
        out_shape=jax.ShapeDtypeStruct((1,), jnp.float32),
        in_specs=[
            pl.BlockSpec(memory_space=pltpu.VMEM),
            pl.BlockSpec(memory_space=pltpu.VMEM),
        ],
        out_specs=pl.BlockSpec(memory_space=pltpu.SMEM),
    )(pred_ranks, targ_ranks)
    return loss[0]


def _spearman_loss_ref(predictions, targets, temperature=0.01):
    # Pure-JAX reference identical to the PyTorch module (sigmoid form).
    p = predictions.astype(jnp.float32)
    t = targets.astype(jnp.float32)
    pd = p[:, None] - p[None, :]
    td = t[:, None] - t[None, :]
    ps = jax.nn.sigmoid(pd / temperature)
    ts = jax.nn.sigmoid(td / temperature)
    pr = jnp.sum(ps, axis=1) + 1.0
    tr = jnp.sum(ts, axis=1) + 1.0
    prc = pr - jnp.mean(pr)
    trc = tr - jnp.mean(tr)
    num = jnp.sum(prc * trc)
    den = jnp.sqrt(jnp.sum(prc ** 2)) * jnp.sqrt(jnp.sum(trc ** 2))
    return -(num / den)


if __name__ == "__main__":
    # Small shapes consistent with the module: 1-D prediction/target vectors.
    kp, kt = jax.random.split(jax.random.PRNGKey(0))
    n = 8
    predictions = jax.random.normal(kp, (n,), dtype=jnp.float32)
    targets = jax.random.normal(kt, (n,), dtype=jnp.float32)

    ref = _spearman_loss_ref(predictions, targets, temperature=0.01)

    # Strict check: explicit f32 compute path (exact on every chip generation).
    loss_f32 = spearman_loss(predictions, targets, temperature=0.01,
                             compute_dtype=jnp.float32)
    loss_f32 = jax.block_until_ready(loss_f32)
    assert jnp.allclose(loss_f32, ref, atol=1e-4, rtol=1e-4), (loss_f32, ref)

    # Non-aligned length to exercise tiling + sentinel padding.
    kp2, kt2 = jax.random.split(jax.random.PRNGKey(1))
    n2 = 300
    predictions2 = jax.random.normal(kp2, (n2,), dtype=jnp.float32)
    targets2 = jax.random.normal(kt2, (n2,), dtype=jnp.float32)
    ref2 = _spearman_loss_ref(predictions2, targets2, temperature=0.01)

    loss2_f32 = spearman_loss(predictions2, targets2, temperature=0.01,
                              compute_dtype=jnp.float32)
    loss2_f32 = jax.block_until_ready(loss2_f32)
    assert jnp.allclose(loss2_f32, ref2, atol=2e-4, rtol=2e-4), (loss2_f32, ref2)

    # Default (chip-gated) compute path: bf16 on v6e/v7x, f32 on v5e and older.
    # bf16 perturbs near-tied pairs of the pre-scaled inputs, so the tolerance
    # is intentionally loose here (it is a loss, not an estimator).
    loss2_auto = jax.block_until_ready(
        spearman_loss(predictions2, targets2, temperature=0.01))
    assert jnp.allclose(loss2_auto, ref2, atol=3e-2), (loss2_auto, ref2)

    print("KERNEL_OK")
</pallas_src>

<mosaic_0001>
module attributes {stable_mosaic.version = 11 : i64} {
  func.func @_soft_rank_kernel(%arg0: i32, %arg1: i32, %arg2: memref<1x128xf32, #tpu.memory_space<vmem>>, %arg3: memref<1x128xf32, #tpu.memory_space<vmem>>, %arg4: memref<128x1xf32, #tpu.memory_space<vmem>>, %arg5: memref<128x1xf32, #tpu.memory_space<vmem>>, %arg6: memref<1x128xf32, #tpu.memory_space<vmem>>, %arg7: memref<1x128xf32, #tpu.memory_space<vmem>>) attributes {dimension_semantics = [#tpu.dimension_semantics<parallel>, #tpu.dimension_semantics<arbitrary>], iteration_bounds = array<i64: 1, 1>, scalar_prefetch = 0 : i64, scratch_operands = 0 : i64, tpu.core_type = #tpu.core_type<tc>, window_params = [{transform_indices = @transform_0, window_bounds = array<i64: 1, 128>}, {transform_indices = @transform_1, window_bounds = array<i64: 1, 128>}, {transform_indices = @transform_2, window_bounds = array<i64: 128, 1>}, {transform_indices = @transform_3, window_bounds = array<i64: 128, 1>}, {transform_indices = @transform_4, window_bounds = array<i64: 1, 128>}, {transform_indices = @transform_5, window_bounds = array<i64: 1, 128>}]} {
    %c0_i32 = arith.constant 0 : i32
    %0 = arith.cmpi eq, %arg1, %c0_i32 : i32
    %1 = arith.extui %0 : i1 to i32
    %c0_i32_0 = arith.constant 0 : i32
    %2 = arith.cmpi ne, %1, %c0_i32_0 : i32
    scf.if %2 {
      %cst_17 = arith.constant 0.000000e+00 : f32
      %25 = vector.broadcast %cst_17 : f32 to vector<1x128xf32>
      %c0_18 = arith.constant 0 : index
      %c0_19 = arith.constant 0 : index
      %26 = vector.load %arg6[%c0_18, %c0_19] : memref<1x128xf32, #tpu.memory_space<vmem>>, vector<1x128xf32>
      tpu.vector_store %arg6[%c0_18, %c0_19], %25 {strides = array<i32>} : memref<1x128xf32, #tpu.memory_space<vmem>>, vector<1x128xf32>,
      %cst_20 = arith.constant 0.000000e+00 : f32
      %27 = vector.broadcast %cst_20 : f32 to vector<1x128xf32>
      %c0_21 = arith.constant 0 : index
      %c0_22 = arith.constant 0 : index
      %28 = vector.load %arg7[%c0_21, %c0_22] : memref<1x128xf32, #tpu.memory_space<vmem>>, vector<1x128xf32>
      tpu.vector_store %arg7[%c0_21, %c0_22], %27 {strides = array<i32>} : memref<1x128xf32, #tpu.memory_space<vmem>>, vector<1x128xf32>,
    } else {
    }
    %c0 = arith.constant 0 : index
    %c0_1 = arith.constant 0 : index
    %3 = vector.load %arg2[%c0, %c0_1] : memref<1x128xf32, #tpu.memory_space<vmem>>, vector<1x128xf32>
    %c0_2 = arith.constant 0 : index
    %c0_3 = arith.constant 0 : index
    %4 = vector.load %arg4[%c0_2, %c0_3] : memref<128x1xf32, #tpu.memory_space<vmem>>, vector<128x1xf32>
    %5 = vector.broadcast %3 : vector<1x128xf32> to vector<128x128xf32>
    %6 = vector.broadcast %4 : vector<128x1xf32> to vector<128x128xf32>
    %7 = arith.subf %5, %6 : vector<128x128xf32>
    %8 = math.tanh %7 : vector<128x128xf32>
    %c0_4 = arith.constant 0 : index
    %c0_5 = arith.constant 0 : index
    %9 = vector.load %arg3[%c0_4, %c0_5] : memref<1x128xf32, #tpu.memory_space<vmem>>, vector<1x128xf32>
    %c0_6 = arith.constant 0 : index
    %c0_7 = arith.constant 0 : index
    %10 = vector.load %arg5[%c0_6, %c0_7] : memref<128x1xf32, #tpu.memory_space<vmem>>, vector<128x1xf32>
    %11 = vector.broadcast %9 : vector<1x128xf32> to vector<128x128xf32>
    %12 = vector.broadcast %10 : vector<128x1xf32> to vector<128x128xf32>
    %13 = arith.subf %11, %12 : vector<128x128xf32>
    %14 = math.tanh %13 : vector<128x128xf32>
    %cst = arith.constant dense<0.000000e+00> : vector<128xf32>
    %15 = vector.multi_reduction <add>, %8, %cst [0] : vector<128x128xf32> to vector<128xf32>
    %16 = vector.shape_cast %15 : vector<128xf32> to vector<1x128xf32>
    %cst_8 = arith.constant dense<0.000000e+00> : vector<128xf32>
    %17 = vector.multi_reduction <add>, %14, %cst_8 [0] : vector<128x128xf32> to vector<128xf32>
    %18 = vector.shape_cast %17 : vector<128xf32> to vector<1x128xf32>
    %c0_9 = arith.constant 0 : index
    %c0_10 = arith.constant 0 : index
    %19 = vector.load %arg6[%c0_9, %c0_10] : memref<1x128xf32, #tpu.memory_space<vmem>>, vector<1x128xf32>
    %20 = arith.addf %19, %16 : vector<1x128xf32>
    %c0_11 = arith.constant 0 : index
    %c0_12 = arith.constant 0 : index
    %21 = vector.load %arg6[%c0_11, %c0_12] : memref<1x128xf32, #tpu.memory_space<vmem>>, vector<1x128xf32>
    tpu.vector_store %arg6[%c0_11, %c0_12], %20 {strides = array<i32>} : memref<1x128xf32, #tpu.memory_space<vmem>>, vector<1x128xf32>,
    %c0_13 = arith.constant 0 : index
    %c0_14 = arith.constant 0 : index
    %22 = vector.load %arg7[%c0_13, %c0_14] : memref<1x128xf32, #tpu.memory_space<vmem>>, vector<1x128xf32>
    %23 = arith.addf %22, %18 : vector<1x128xf32>
    %c0_15 = arith.constant 0 : index
    %c0_16 = arith.constant 0 : index
    %24 = vector.load %arg7[%c0_15, %c0_16] : memref<1x128xf32, #tpu.memory_space<vmem>>, vector<1x128xf32>
    tpu.vector_store %arg7[%c0_15, %c0_16], %23 {strides = array<i32>} : memref<1x128xf32, #tpu.memory_space<vmem>>, vector<1x128xf32>,
    return
  }
  func.func @transform_0(%arg0: i32, %arg1: i32) -> (i32, i32) {
    %c0_i32 = arith.constant 0 : i32
    %c0_i32_0 = arith.constant 0 : i32
    return %c0_i32, %arg0 : i32, i32
  }
  func.func @transform_1(%arg0: i32, %arg1: i32) -> (i32, i32) {
    %c0_i32 = arith.constant 0 : i32
    %c0_i32_0 = arith.constant 0 : i32
    return %c0_i32, %arg0 : i32, i32
  }
  func.func @transform_2(%arg0: i32, %arg1: i32) -> (i32, i32) {
    %c0_i32 = arith.constant 0 : i32
    %c0_i32_0 = arith.constant 0 : i32
    return %arg1, %c0_i32 : i32, i32
  }
  func.func @transform_3(%arg0: i32, %arg1: i32) -> (i32, i32) {
    %c0_i32 = arith.constant 0 : i32
    %c0_i32_0 = arith.constant 0 : i32
    return %arg1, %c0_i32 : i32, i32
  }
  func.func @transform_4(%arg0: i32, %arg1: i32) -> (i32, i32) {
    %c0_i32 = arith.constant 0 : i32
    %c0_i32_0 = arith.constant 0 : i32
    return %c0_i32, %arg0 : i32, i32
  }
  func.func @transform_5(%arg0: i32, %arg1: i32) -> (i32, i32) {
    %c0_i32 = arith.constant 0 : i32
    %c0_i32_0 = arith.constant 0 : i32
    return %c0_i32, %arg0 : i32, i32
  }
}

</mosaic_0001>

<bundles_post_ra>
// kernel: tpu_custom_call.1
= control target key start
LH: loop header
LB: loop body
LE: loop exit
PB: predicated region body
PF: predicated region fallthrough
CT: control target
= control target key end

     0   :  { %11 = vsyncpa [#allocation3], 0  ;;  %s803_s0 = inlined_call_operand.hbm [shape: f32[1,128], index: 0, kind: input, shape index: {}]   ;;  %s804_s1 = inlined_call_operand.hbm [shape: f32[1,128], index: 1, kind: input, shape index: {}]   ;;  %s805_s2 = inlined_call_operand.hbm [shape: f32[128,1], index: 2, kind: input, shape index: {}]   ;;  %s806_s3 = inlined_call_operand.hbm [shape: f32[128,1], index: 3, kind: input, shape index: {}]   ;;  %s807_s4 = inlined_call_operand.hbm [shape: f32[1,128], index: 4, kind: output, shape index: {0}]   ;;  %s808_s5 = inlined_call_operand.hbm [shape: f32[1,128], index: 5, kind: output, shape index: {1}]  }
   0x1   :  { %12 = vsyncpa [#allocation6], 0 }
   0x2   :  { %13 = vsyncpa [#allocation9], 0 }
   0x3   :  { %14 = vsyncpa [#allocation4], 0 }
   0x4   :  { %15 = vsyncpa [#allocation12], 0  ;;  %s647_s18 = smov [#allocation5]   ;;  %s648_s20 = smov [#allocation2]  }
   0x5   :  { %s32_s19 = sshll.u32 %s647_s18, 4  ;;  %s22_s21 = sshll.u32 %s648_s20, 4  ;;  %s33_s19 = int_to_ptr.vmem [resolvable:$true] %s32_s19  ;;  %s23_s21 = int_to_ptr.vmem [resolvable:$true] %s22_s21 }
   0x6   :  { %s505_s24 = scalar_lea.hbm %s804_s1, 16 }
   0x7   :  { %p506_p0 = scmp.ne.s32.totalorder %s804_s1, %s505_s24  ;;  %p509_p1 = scmp.lt.u32.totalorder %s505_s24, %s804_s1 }
   0x9   :  { %p511_p2 = pnand %p509_p1, %p506_p0 }
   0xb   :  { %514 = shalt.err (!%p511_p2)
}
   0xc   :  { %s515_s29 = scalar_lea.vmem %s33_s19, 16  ;;  %s519_s30 = scalar_lea.vmem %s33_s19, 32 }
   0xd   :  { %p516_p3 = scmp.ne.s32.totalorder %s33_s19, %s515_s29  ;;  %p520_p4 = scmp.lt.s32.totalorder %s33_s19, %s33_s19 }
   0xe   :  { %p521_p5 = scmp.lt.s32.totalorder %s519_s30, %s515_s29 }
  0x10   :  { %p522_p6 = por %p521_p5, %p520_p4 }
  0x12   :  { %p523_p7 = pnand %p522_p6, %p516_p3 }
  0x14   :  { %526 = shalt.err (!%p523_p7)
}
  0x15   :  { %35 = dma.hbm_to_vmem [thread:$0]  %s804_s1, 16, %s33_s19, [#allocation6]  }
  0x16   :  { %s527_s10 = scalar_lea.hbm %s803_s0, 16 }
  0x17   :  { %p528_p8 = scmp.ne.s32.totalorder %s803_s0, %s527_s10  ;;  %p531_p9 = scmp.lt.u32.totalorder %s527_s10, %s803_s0 }
  0x19   :  { %p533_p10 = pnand %p531_p9, %p528_p8 }
  0x1b   :  { %536 = shalt.err (!%p533_p10)
}
  0x1c   :  { %s537_s15 = scalar_lea.vmem %s23_s21, 16  ;;  %s541_s16 = scalar_lea.vmem %s23_s21, 32 }
  0x1d   :  { %p538_p11 = scmp.ne.s32.totalorder %s23_s21, %s537_s15  ;;  %p542_p12 = scmp.lt.s32.totalorder %s23_s21, %s23_s21 }
  0x1e   :  { %p543_p13 = scmp.lt.s32.totalorder %s541_s16, %s537_s15 }
  0x20   :  { %p544_p0 = por %p543_p13, %p542_p12 }
  0x22   :  { %p545_p1 = pnand %p544_p0, %p538_p11 }
  0x24   :  { %548 = shalt.err (!%p545_p1)
}
  0x25   :  { %25 = dma.hbm_to_vmem [thread:$0]  %s803_s0, 16, %s23_s21, [#allocation3]  }
  0x26   :  { %s649_s18 = smov [#allocation7]   ;;  %s549_s23 = scalar_lea.hbm %s805_s2, 2048 }
  0x27   :  { %s41_s19 = sshll.u32 %s649_s18, 4  ;;  %p550_p2 = scmp.ne.s32.totalorder %s805_s2, %s549_s23  ;;  %s42_s19 = int_to_ptr.vmem [resolvable:$true] %s41_s19 }
  0x28   :  { %p553_p3 = scmp.lt.u32.totalorder %s549_s23, %s805_s2 }
  0x2a   :  { %p555_p4 = pnand %p553_p3, %p550_p2 }
  0x2c   :  { %558 = shalt.err (!%p555_p4)
}
  0x2d   :  { %s559_s28 = scalar_lea.vmem %s42_s19, 2048  ;;  %p564_p6 = scmp.lt.s32.totalorder %s42_s19, %s42_s19 }
  0x2e   :  { %p560_p5 = scmp.ne.s32.totalorder %s42_s19, %s559_s28  ;;  %p565_p7 = scmp.lt.s32.totalorder %s559_s28, %s559_s28 }
  0x30   :  { %p566_p8 = por %p565_p7, %p564_p6 }
  0x32   :  { %p567_p9 = pnand %p566_p8, %p560_p5 }
  0x34   :  { %570 = shalt.err (!%p567_p9)
}
  0x35   :  { %s650_s0 = smov 128   ;;  %s651_s21 = smov 8  }
  0x36   :  { %47 = dma.hbm_to_vmem [thread:$0]  %s805_s2, 2048, %s42_s19, [#allocation6], %s650_s0, %s650_s0, %s651_s21  }
  0x37   :  { %s652_s6 = smov [#allocation8]   ;;  %s571_s10 = scalar_lea.hbm %s806_s3, 2048 }
  0x38   :  { %s53_s7 = sshll.u32 %s652_s6, 4  ;;  %p572_p10 = scmp.ne.s32.totalorder %s806_s3, %s571_s10  ;;  %s54_s7 = int_to_ptr.vmem [resolvable:$true] %s53_s7 }
  0x39   :  { %p575_p11 = scmp.lt.u32.totalorder %s571_s10, %s806_s3 }
  0x3b   :  { %p577_p12 = pnand %p575_p11, %p572_p10 }
  0x3d   :  { %580 = shalt.err (!%p577_p12)
}
  0x3e   :  { %s581_s15 = scalar_lea.vmem %s54_s7, 2048  ;;  %p586_p0 = scmp.lt.s32.totalorder %s54_s7, %s54_s7 }
  0x3f   :  { %p582_p13 = scmp.ne.s32.totalorder %s54_s7, %s581_s15  ;;  %p587_p1 = scmp.lt.s32.totalorder %s581_s15, %s581_s15 }
  0x41   :  { %p588_p2 = por %p587_p1, %p586_p0 }
  0x43   :  { %p589_p3 = pnand %p588_p2, %p582_p13 }
  0x45   :  { %592 = shalt.err (!%p589_p3)
}
  0x46   :  { %59 = dma.hbm_to_vmem [thread:$0]  %s806_s3, 2048, %s54_s7, [#allocation9], %s650_s0, %s650_s0, %s651_s21  }
  0x47   :  { %637 = dma.done.wait [#allocation3], 16  }
  0x48   :  { %638 = vsyncadd [#allocation3], 4294967280 }
  0x49   :  { %639 = dma.done.wait [#allocation6], 2064  }
  0x4a   :  { %640 = vsyncadd [#allocation6], 4294965232 }
  0x4b   :  { %641 = dma.done.wait [#allocation9], 2048  }
  0x4c   :  { %642 = vsyncadd [#allocation9], 4294965248  ;;  %v653_v0 = vmov 0   ;;  %v214_v1 = vld [vmem:[#allocation8] sm:$0xff]  ;;  %v215_v3 = vld [vmem:[#allocation8 + $0x8] sm:$0xff]  ;;  %v654_v33 = vmov 0.0  }
  0x4d   :  { %440 = vset.pattern.permute.xlu1 %v653_v0  ;;  %439 = vset.pattern.permute.xlu0 %v653_v0  ;;  %v79_v2 = vld [vmem:[#allocation7] sm:$0xff]  ;;  %v80_v4 = vld [vmem:[#allocation7 + $0x8] sm:$0xff]  ;;  %v216_v5 = vld [vmem:[#allocation8 + $0x10] sm:$0xff]  ;;  %76 = vst [vmem:[#allocation10] sm:$0x1] %v654_v33  ;;  %s655_s3 = smov [#allocation11]  }
  0x4e   :  { %238 = vperm.xlu1 %440, %v214_v1   ;;  %103 = vperm.xlu0 %439, %v79_v2   ;;  %v81_v6 = vld [vmem:[#allocation7 + $0x10] sm:$0xff]  ;;  %v217_v7 = vld [vmem:[#allocation8 + $0x18] sm:$0xff]  ;;  %v218_v9 = vld [vmem:[#allocation8 + $0x20] sm:$0xff]  ;;  %77 = vst [vmem:[#allocation11] sm:$0x1] %v654_v33  ;;  %s412_s1 = sshll.u32 %s655_s3, 4  ;;  %s413_s1 = int_to_ptr.vmem [resolvable:$true] %s412_s1 }
  0x4f   :  { %v82_v8 = vld [vmem:[#allocation7 + $0x18] sm:$0xff]  ;;  %v83_v10 = vld [vmem:[#allocation7 + $0x20] sm:$0xff]  ;;  %v219_v11 = vld [vmem:[#allocation8 + $0x28] sm:$0xff]  ;;  %s656_s17 = smov [#allocation10]   ;;  %s593_s19 = scalar_lea.vmem %s413_s1, 16 }
  0x50   :  { %v84_v12 = vld [vmem:[#allocation7 + $0x28] sm:$0xff]  ;;  %v220_v13 = vld [vmem:[#allocation8 + $0x30] sm:$0xff]  ;;  %v221_v15 = vld [vmem:[#allocation8 + $0x38] sm:$0xff]  ;;  %s402_s18 = sshll.u32 %s656_s17, 4  ;;  %p594_p4 = scmp.ne.s32.totalorder %s413_s1, %s593_s19  ;;  %s771_s18 = int_to_ptr.vmem [resolvable:$true] %s402_s18 }
  0x51   :  { %v85_v14 = vld [vmem:[#allocation7 + $0x30] sm:$0xff]  ;;  %v86_v16 = vld [vmem:[#allocation7 + $0x38] sm:$0xff]  ;;  %v222_v17 = vld [vmem:[#allocation8 + $0x40] sm:$0xff]  ;;  %s597_s20 = scalar_lea.vmem %s413_s1, 32  ;;  %p598_p5 = scmp.lt.s32.totalorder %s413_s1, %s413_s1 }
  0x52   :  { %243 = vperm.xlu1 %440, %v215_v3   ;;  %108 = vperm.xlu0 %439, %v80_v4   ;;  %v87_v18 = vld [vmem:[#allocation7 + $0x40] sm:$0xff]  ;;  %v223_v19 = vld [vmem:[#allocation8 + $0x48] sm:$0xff]  ;;  %v224_v21 = vld [vmem:[#allocation8 + $0x50] sm:$0xff]  ;;  %p599_p6 = scmp.lt.s32.totalorder %s597_s20, %s593_s19 }
  0x53   :  { %v88_v20 = vld [vmem:[#allocation7 + $0x48] sm:$0xff]  ;;  %v89_v22 = vld [vmem:[#allocation7 + $0x50] sm:$0xff]  ;;  %v225_v23 = vld [vmem:[#allocation8 + $0x58] sm:$0xff] }
  0x54   :  { %v90_v24 = vld [vmem:[#allocation7 + $0x58] sm:$0xff]  ;;  %v226_v25 = vld [vmem:[#allocation8 + $0x60] sm:$0xff]  ;;  %v227_v27 = vld [vmem:[#allocation8 + $0x68] sm:$0xff]  ;;  %p600_p7 = por %p599_p6, %p598_p5 }
  0x55   :  { %v91_v26 = vld [vmem:[#allocation7 + $0x60] sm:$0xff]  ;;  %v92_v28 = vld [vmem:[#allocation7 + $0x68] sm:$0xff]  ;;  %v228_v29 = vld [vmem:[#allocation8 + $0x70] sm:$0xff] }
  0x56   :  { %248 = vperm.xlu1 %440, %v216_v5   ;;  %113 = vperm.xlu0 %439, %v81_v6   ;;  %v93_v30 = vld [vmem:[#allocation7 + $0x70] sm:$0xff]  ;;  %v229_v31 = vld [vmem:[#allocation8 + $0x78] sm:$0xff]  ;;  %p601_p8 = pnand %p600_p7, %p594_p4 }
  0x57   :  { %v94_v32 = vld [vmem:[#allocation7 + $0x78] sm:$0xff] }
  0x58   :  { %v735_v46 = vld [vmem:[#allocation5] ss:$0 sm:$0xff]  ;;  %v737_v49 = vld [vmem:[#allocation2] ss:$0 sm:$0xff] }
  0x5a   :  { %253 = vperm.xlu1 %440, %v217_v7   ;;  %118 = vperm.xlu0 %439, %v82_v8  }
  0x5e   :  { %258 = vperm.xlu1 %440, %v218_v9   ;;  %123 = vperm.xlu0 %439, %v83_v10  }
  0x62   :  { %263 = vperm.xlu1 %440, %v219_v11   ;;  %128 = vperm.xlu0 %439, %v84_v12  }
  0x66   :  { %268 = vperm.xlu1 %440, %v220_v13   ;;  %133 = vperm.xlu0 %439, %v85_v14  }
  0x6a   :  { %273 = vperm.xlu1 %440, %v221_v15   ;;  %138 = vperm.xlu0 %439, %v86_v16  }
  0x6e   :  { %278 = vperm.xlu1 %440, %v222_v17   ;;  %143 = vperm.xlu0 %439, %v87_v18  }
  0x72   :  { %283 = vperm.xlu1 %440, %v223_v19   ;;  %148 = vperm.xlu0 %439, %v88_v20  }
  0x76   :  { %288 = vperm.xlu1 %440, %v224_v21   ;;  %153 = vperm.xlu0 %439, %v89_v22  }
  0x7a   :  { %293 = vperm.xlu1 %440, %v225_v23   ;;  %158 = vperm.xlu0 %439, %v90_v24  }
  0x7e   :  { %298 = vperm.xlu1 %440, %v226_v25   ;;  %163 = vperm.xlu0 %439, %v91_v26  }
  0x82   :  { %303 = vperm.xlu1 %440, %v227_v27   ;;  %168 = vperm.xlu0 %439, %v92_v28  }
  0x86   :  { %308 = vperm.xlu1 %440, %v228_v29   ;;  %173 = vperm.xlu0 %439, %v93_v30  }
  0x8a   :  { %313 = vperm.xlu1 %440, %v229_v31   ;;  %178 = vperm.xlu0 %439, %v94_v32  }
  0xcd   :  { %v239_v34 = vpop.permute.xlu1 %238  ;;  %v104_v35 = vpop.permute.xlu0 %103 }
  0xce   :  { %v316_v50 = vsub.f32 %v735_v46, %v239_v34  ;;  %v181_v51 = vsub.f32 %v737_v49, %v104_v35 }
  0xd0   :  { %441 = vtanh.f32 %v316_v50 }
  0xd1   :  { %v244_v36 = vpop.permute.xlu1 %243  ;;  %v109_v37 = vpop.permute.xlu0 %108  ;;  %443 = vtanh.f32 %v181_v51 }
  0xd2   :  { %v317_v54 = vsub.f32 %v735_v46, %v244_v36  ;;  %v182_v55 = vsub.f32 %v737_v49, %v109_v37 }
  0xd4   :  { %445 = vtanh.f32 %v317_v54 }
  0xd5   :  { %v249_v38 = vpop.permute.xlu1 %248  ;;  %v114_v39 = vpop.permute.xlu0 %113  ;;  %447 = vtanh.f32 %v182_v55 }
  0xd6   :  { %v318_v56 = vsub.f32 %v735_v46, %v249_v38  ;;  %v183_v57 = vsub.f32 %v737_v49, %v114_v39 }
  0xd8   :  { %449 = vtanh.f32 %v318_v56 }
  0xd9   :  { %v254_v40 = vpop.permute.xlu1 %253  ;;  %v119_v41 = vpop.permute.xlu0 %118  ;;  %451 = vtanh.f32 %v183_v57 }
  0xda   :  { %v319_v60 = vsub.f32 %v735_v46, %v254_v40  ;;  %v184_v61 = vsub.f32 %v737_v49, %v119_v41  ;;  %v442_v8 = vpop.eup %441 }
  0xdb   :  { %v444_v10 = vpop.eup %443 }
  0xdc   :  { %453 = vtanh.f32 %v319_v60 }
  0xdd   :  { %v259_v42 = vpop.permute.xlu1 %258  ;;  %v124_v43 = vpop.permute.xlu0 %123  ;;  %455 = vtanh.f32 %v184_v61 }
  0xde   :  { %v320_v62 = vsub.f32 %v735_v46, %v259_v42  ;;  %v185_v63 = vsub.f32 %v737_v49, %v124_v43  ;;  %v446_v12 = vpop.eup %445 }
  0xdf   :  { %v448_v14 = vpop.eup %447  ;;  %v369_v21 = vadd.f32 %v446_v12, %v442_v8 }
  0xe0   :  { %457 = vtanh.f32 %v320_v62  ;;  %v348_v24 = vadd.f32 %v448_v14, %v444_v10 }
  0xe1   :  { %v264_v44 = vpop.permute.xlu1 %263  ;;  %v129_v45 = vpop.permute.xlu0 %128  ;;  %459 = vtanh.f32 %v185_v63 }
  0xe2   :  { %v321_v2 = vsub.f32 %v735_v46, %v264_v44  ;;  %v186_v3 = vsub.f32 %v737_v49, %v129_v45  ;;  %v450_v18 = vpop.eup %449 }
  0xe3   :  { %v452_v20 = vpop.eup %451  ;;  %v370_v27 = vadd.f32 %v450_v18, %v369_v21 }
  0xe4   :  { %461 = vtanh.f32 %v321_v2  ;;  %v349_v32 = vadd.f32 %v452_v20, %v348_v24 }
  0xe5   :  { %v269_v47 = vpop.permute.xlu1 %268  ;;  %v134_v48 = vpop.permute.xlu0 %133  ;;  %463 = vtanh.f32 %v186_v3 }
  0xe6   :  { %v322_v4 = vsub.f32 %v735_v46, %v269_v47  ;;  %v187_v5 = vsub.f32 %v737_v49, %v134_v48  ;;  %v454_v23 = vpop.eup %453 }
  0xe7   :  { %v456_v26 = vpop.eup %455  ;;  %v371_v35 = vadd.f32 %v454_v23, %v370_v27 }
  0xe8   :  { %465 = vtanh.f32 %v322_v4  ;;  %v350_v38 = vadd.f32 %v456_v26, %v349_v32 }
  0xe9   :  { %v274_v52 = vpop.permute.xlu1 %273  ;;  %v139_v53 = vpop.permute.xlu0 %138  ;;  %467 = vtanh.f32 %v187_v5 }
  0xea   :  { %v323_v9 = vsub.f32 %v735_v46, %v274_v52  ;;  %v188_v11 = vsub.f32 %v737_v49, %v139_v53  ;;  %v458_v31 = vpop.eup %457 }
  0xeb   :  { %v460_v34 = vpop.eup %459  ;;  %v372_v41 = vadd.f32 %v458_v31, %v371_v35 }
  0xec   :  { %469 = vtanh.f32 %v323_v9  ;;  %v351_v47 = vadd.f32 %v460_v34, %v350_v38 }
  0xed   :  { %v279_v58 = vpop.permute.xlu1 %278  ;;  %v144_v59 = vpop.permute.xlu0 %143  ;;  %471 = vtanh.f32 %v188_v11 }
  0xee   :  { %v324_v13 = vsub.f32 %v735_v46, %v279_v58  ;;  %v189_v15 = vsub.f32 %v737_v49, %v144_v59  ;;  %v462_v37 = vpop.eup %461 }
  0xef   :  { %v464_v40 = vpop.eup %463  ;;  %v373_v51 = vadd.f32 %v462_v37, %v372_v41 }
  0xf0   :  { %473 = vtanh.f32 %v324_v13  ;;  %v352_v54 = vadd.f32 %v464_v40, %v351_v47 }
  0xf1   :  { %v284_v0 = vpop.permute.xlu1 %283  ;;  %v149_v1 = vpop.permute.xlu0 %148  ;;  %475 = vtanh.f32 %v189_v15 }
  0xf2   :  { %v325_v19 = vsub.f32 %v735_v46, %v284_v0  ;;  %v190_v22 = vsub.f32 %v737_v49, %v149_v1  ;;  %v466_v45 = vpop.eup %465 }
  0xf3   :  { %v468_v50 = vpop.eup %467  ;;  %v374_v56 = vadd.f32 %v466_v45, %v373_v51  ;;  %v390_v45 = vld [vmem:[#allocation10] sm:$0x1] }
  0xf4   :  { %477 = vtanh.f32 %v325_v19  ;;  %v353_v60 = vadd.f32 %v468_v50, %v352_v54 }
  0xf5   :  { %v289_v6 = vpop.permute.xlu1 %288  ;;  %v154_v7 = vpop.permute.xlu0 %153  ;;  %479 = vtanh.f32 %v190_v22 }
  0xf6   :  { %v326_v25 = vsub.f32 %v735_v46, %v289_v6  ;;  %v191_v28 = vsub.f32 %v737_v49, %v154_v7  ;;  %v470_v53 = vpop.eup %469 }
  0xf7   :  { %v472_v55 = vpop.eup %471  ;;  %v375_v0 = vadd.f32 %v470_v53, %v374_v56 }
  0xf8   :  { %481 = vtanh.f32 %v326_v25  ;;  %v354_v2 = vadd.f32 %v472_v55, %v353_v60 }
  0xf9   :  { %v294_v16 = vpop.permute.xlu1 %293  ;;  %v159_v17 = vpop.permute.xlu0 %158  ;;  %483 = vtanh.f32 %v191_v28 }
  0xfa   :  { %v327_v33 = vsub.f32 %v735_v46, %v294_v16  ;;  %v192_v36 = vsub.f32 %v737_v49, %v159_v17  ;;  %v474_v59 = vpop.eup %473 }
  0xfb   :  { %v476_v63 = vpop.eup %475  ;;  %v376_v4 = vadd.f32 %v474_v59, %v375_v0 }
  0xfc   :  { %485 = vtanh.f32 %v327_v33  ;;  %v355_v8 = vadd.f32 %v476_v63, %v354_v2 }
  0xfd   :  { %v299_v29 = vpop.permute.xlu1 %298  ;;  %v164_v30 = vpop.permute.xlu0 %163  ;;  %487 = vtanh.f32 %v192_v36 }
  0xfe   :  { %v328_v39 = vsub.f32 %v735_v46, %v299_v29  ;;  %v193_v42 = vsub.f32 %v737_v49, %v164_v30  ;;  %v478_v1 = vpop.eup %477 }
  0xff   :  { %v480_v3 = vpop.eup %479  ;;  %v377_v12 = vadd.f32 %v478_v1, %v376_v4 }
 0x100   :  { %489 = vtanh.f32 %v328_v39  ;;  %v356_v14 = vadd.f32 %v480_v3, %v355_v8 }
 0x101   :  { %v304_v43 = vpop.permute.xlu1 %303  ;;  %v169_v44 = vpop.permute.xlu0 %168  ;;  %491 = vtanh.f32 %v193_v42 }
 0x102   :  { %v329_v48 = vsub.f32 %v735_v46, %v304_v43  ;;  %v194_v52 = vsub.f32 %v737_v49, %v169_v44  ;;  %v482_v7 = vpop.eup %481  ;;  %v393_v44 = vld [vmem:[#allocation11] sm:$0x1] }
 0x103   :  { %v484_v11 = vpop.eup %483  ;;  %v378_v16 = vadd.f32 %v482_v7, %v377_v12 }
 0x104   :  { %493 = vtanh.f32 %v329_v48  ;;  %v357_v18 = vadd.f32 %v484_v11, %v356_v14 }
 0x105   :  { %v309_v57 = vpop.permute.xlu1 %308  ;;  %v174_v58 = vpop.permute.xlu0 %173  ;;  %495 = vtanh.f32 %v194_v52 }
 0x106   :  { %v330_v61 = vsub.f32 %v735_v46, %v309_v57  ;;  %v195_v62 = vsub.f32 %v737_v49, %v174_v58  ;;  %v486_v13 = vpop.eup %485 }
 0x107   :  { %v488_v15 = vpop.eup %487  ;;  %v379_v20 = vadd.f32 %v486_v13, %v378_v16 }
 0x108   :  { %497 = vtanh.f32 %v330_v61  ;;  %v358_v22 = vadd.f32 %v488_v15, %v357_v18 }
 0x109   :  { %499 = vtanh.f32 %v195_v62  ;;  %v314_v5 = vpop.permute.xlu1 %313  ;;  %v179_v6 = vpop.permute.xlu0 %178 }
 0x10a   :  { %v331_v9 = vsub.f32 %v735_v46, %v314_v5  ;;  %v196_v10 = vsub.f32 %v737_v49, %v179_v6  ;;  %v490_v17 = vpop.eup %489 }
 0x10b   :  { %v492_v19 = vpop.eup %491  ;;  %v380_v24 = vadd.f32 %v490_v17, %v379_v20 }
 0x10c   :  { %501 = vtanh.f32 %v331_v9  ;;  %v359_v46 = vadd.f32 %v492_v19, %v358_v22 }
 0x10d   :  { %503 = vtanh.f32 %v196_v10 }
 0x10e   :  { %v494_v21 = vpop.eup %493 }
 0x10f   :  { %v496_v23 = vpop.eup %495  ;;  %v381_v49 = vadd.f32 %v494_v21, %v380_v24 }
 0x110   :  { %v360_v27 = vadd.f32 %v496_v23, %v359_v46 }
 0x112   :  { %v498_v25 = vpop.eup %497 }
 0x113   :  { %v500_v26 = vpop.eup %499  ;;  %v382_v28 = vadd.f32 %v498_v25, %v381_v49 }
 0x114   :  { %v361_v30 = vadd.f32 %v500_v26, %v360_v27 }
 0x116   :  { %v502_v29 = vpop.eup %501 }
 0x117   :  { %v504_v31 = vpop.eup %503  ;;  %v383_v32 = vadd.f32 %v502_v29, %v382_v28 }
 0x118   :  { %v362_v33 = vadd.f32 %v504_v31, %v361_v30 }
 0x119   :  { %v384_v34 = vrot.slane %v383_v32, 4 }
 0x11a   :  { %v363_v35 = vrot.slane %v362_v33, 4 }
 0x11b   :  { %v385_v36 = vadd.f32 %v384_v34, %v383_v32 }
 0x11c   :  { %v364_v37 = vadd.f32 %v363_v35, %v362_v33 }
 0x11d   :  { %v386_v38 = vrot.slane %v385_v36, 2 }
 0x11e   :  { %v365_v39 = vrot.slane %v364_v37, 2 }
 0x11f   :  { %v387_v40 = vadd.f32 %v386_v38, %v385_v36 }
 0x120   :  { %v366_v41 = vadd.f32 %v365_v39, %v364_v37 }
 0x121   :  { %v388_v42 = vrot.slane %v387_v40, 1 }
 0x122   :  { %v367_v43 = vrot.slane %v366_v41, 1 }
 0x123   :  { %v389_v47 = vadd.f32 %v388_v42, %v387_v40 }
 0x124   :  { %v368_v48 = vadd.f32 %v367_v43, %v366_v41 }
 0x125   :  { %v394_v50 = vadd.f32 %v393_v44, %v389_v47 }
 0x126   :  { %v391_v51 = vadd.f32 %v390_v45, %v368_v48 }
 0x127   :  { %395 = vst [vmem:[#allocation11] sm:$0x1] %v394_v50 }
 0x128   :  { %392 = vst [vmem:[#allocation10] sm:$0x1] %v391_v51 }
 0x129   :  { %604 = shalt.err (!%p601_p8)
}
 0x12a   :  { %s605_s24 = scalar_lea.hbm %s808_s5, 16 }
 0x12b   :  { %p606_p9 = scmp.ne.s32.totalorder %s808_s5, %s605_s24  ;;  %p609_p10 = scmp.lt.u32.totalorder %s605_s24, %s808_s5 }
 0x12d   :  { %p611_p11 = pnand %p609_p10, %p606_p9 }
 0x12f   :  { %614 = shalt.err (!%p611_p11)
}
 0x130   :  { %415 = dma.vmem_to_hbm [thread:$0]  %s413_s1, 16, %s808_s5, [#allocation12]  }
 0x131   :  { %s615_s29 = scalar_lea.vmem %s771_s18, 16  ;;  %s619_s30 = scalar_lea.vmem %s771_s18, 32 }
 0x132   :  { %p616_p12 = scmp.ne.s32.totalorder %s771_s18, %s615_s29  ;;  %p620_p13 = scmp.lt.s32.totalorder %s771_s18, %s771_s18 }
 0x133   :  { %p621_p0 = scmp.lt.s32.totalorder %s619_s30, %s615_s29 }
 0x135   :  { %p622_p1 = por %p621_p0, %p620_p13 }
 0x137   :  { %p623_p2 = pnand %p622_p1, %p616_p12 }
 0x139   :  { %626 = shalt.err (!%p623_p2)
}
 0x13a   :  { %s627_s8 = scalar_lea.hbm %s807_s4, 16 }
 0x13b   :  { %p628_p3 = scmp.ne.s32.totalorder %s807_s4, %s627_s8  ;;  %p631_p4 = scmp.lt.u32.totalorder %s627_s8, %s807_s4 }
 0x13d   :  { %p633_p5 = pnand %p631_p4, %p628_p3 }
 0x13f   :  { %636 = shalt.err (!%p633_p5)
}
 0x140   :  { %405 = dma.vmem_to_hbm [thread:$0]  %s771_s18, 16, %s807_s4, [#allocation4]  }
 0x141   :  { %643 = dma.done.wait [#allocation4], 16  }
 0x142   :  { %644 = vsyncadd [#allocation4], 4294967280 }
 0x143   :  { %645 = dma.done.wait [#allocation12], 16  }
 0x144   :  { %646 = vsyncadd [#allocation12], 4294967280 }
 0x145   :  { %422 = vsyncpa [#allocation3], 1 }
 0x146   :  { %423 = vsyncpa [#allocation6], 1 }
 0x147   :  { %424 = vsyncpa [#allocation9], 1 }
 0x148   :  { %425 = vsyncpa [#allocation4], 1 }
 0x149   :  { %426 = vsyncpa [#allocation12], 1 }

</bundles_post_ra>
